<compile_context>
chip_gen: v7x
topology: tpu7x:2x2x1
jax: 0.10.0
libtpu: 0.0.40
codegen_flags: <defaults>
</compile_context>

<pallas_src>
import jax
import jax.numpy as jnp
from jax.experimental import pallas as pl
from jax.experimental.pallas import tpu as pltpu

_LANE = 128   # lane-dense feature width: hidden / fc-out axes padded to this
_ATT_W = 8    # packed attention-vector matrix width (col0=a_dst, col1=a_src)


# ----------------------------- Pallas kernel -------------------------------


def _gat_model_kernel(x_ref, bias_ref, pool_ref,
                      w1_ref, a1_ref, b1_ref,
                      w2_ref, a2_ref, b2_ref,
                      wfc_ref, bfc_ref,
                      out_ref):
    """Fused forward: GATConv+ReLU -> GATConv+ReLU -> mean-pool -> Linear.

    PyG GATConv(heads=1) semantics per layer:
        h        = x @ W
        e_{i<-j} = leaky_relu(a_dst . h_i + a_src . h_j, 0.2)
        alpha    = softmax over incoming edges j of node i
        out_i    = sum_j alpha_{ij} h_j + bias
    """
    att_bias = bias_ref[...]                        # [N, N] bf16 additive mask

    def gat_layer(x_bf, w_ref, a_ref, b_ref):
        # MXU matmuls in bf16, accumulation & elementwise math in f32.
        h = jnp.dot(x_bf, w_ref[...], preferred_element_type=jnp.float32)
        h_bf = h.astype(jnp.bfloat16)                            # [N, Hp]

        # a_ref: [Hp, 8] bf16, col 0 = a_dst, col 1 = a_src (rest zero)
        s = jnp.dot(h_bf, a_ref[...], preferred_element_type=jnp.float32)
        s_dst = s[:, 0:1]                                        # [N, 1]
        s_src = s[:, 1:2]                                        # [N, 1]

        e = s_dst + jnp.transpose(s_src)                         # [N, N]
        e = jnp.where(e > 0, e, 0.2 * e)                         # leaky_relu(0.2)
        e = e + att_bias                                         # mask (additive)

        e_max = jnp.max(e, axis=-1, keepdims=True)
        p = jnp.exp(e - e_max)            # masked entries underflow to exactly 0
        denom = jnp.sum(p, axis=-1, keepdims=True)
        alpha = p * pl.reciprocal(denom, approx=True)            # EUP vrcp

        out = jnp.dot(alpha.astype(jnp.bfloat16), h_bf,
                      preferred_element_type=jnp.float32) + b_ref[...]
        return jnp.maximum(out, 0.0).astype(jnp.bfloat16)        # ReLU, bf16 out

    h1 = gat_layer(x_ref[...].astype(jnp.bfloat16), w1_ref, a1_ref, b1_ref)
    h2 = gat_layer(h1, w2_ref, a2_ref, b2_ref)                   # [N, Hp] bf16

    pooled = jnp.dot(pool_ref[...], h2,
                     preferred_element_type=jnp.float32)         # [G, Hp]
    out_ref[...] = jnp.dot(pooled.astype(jnp.bfloat16), wfc_ref[...],
                           preferred_element_type=jnp.float32) + bfc_ref[...]


# ------------------------------- wrappers ----------------------------------

_VMEM = pl.BlockSpec(memory_space=pltpu.MemorySpace.VMEM)


def _pad_last(a, width):
    pad = width - a.shape[-1]
    return jnp.pad(a, [(0, 0)] * (a.ndim - 1) + [(0, pad)]) if pad > 0 else a


def _pad_first(a, length):
    pad = length - a.shape[0]
    return jnp.pad(a, [(0, pad)] + [(0, 0)] * (a.ndim - 1)) if pad > 0 else a


def prepare_params(params):
    """Zero-pad feature axes to _LANE (lane-dense), pack each layer's attention
    vectors as one tiny [Hp, 8] matrix (col0=a_dst, col1=a_src) and pre-cast
    everything to bf16 so the kernel never casts a weight ref."""
    bf = jnp.bfloat16

    def att(a_dst, a_src):
        a = jnp.concatenate([a_dst.T, a_src.T], axis=1)          # [H, 2]
        return _pad_last(_pad_first(a, _LANE), _ATT_W).astype(bf)  # [Hp, 8]

    return {
        "w1": _pad_last(params["w1"], _LANE).astype(bf),               # [Fin, Hp]
        "a1": att(params["a1_dst"], params["a1_src"]),
        "b1": _pad_last(params["b1"], _LANE).astype(bf),
        "w2": _pad_last(_pad_first(params["w2"], _LANE), _LANE).astype(bf),
        "a2": att(params["a2_dst"], params["a2_src"]),
        "b2": _pad_last(params["b2"], _LANE).astype(bf),
        "w_fc": _pad_last(_pad_first(params["w_fc"], _LANE), _LANE).astype(bf),
        "b_fc": _pad_last(params["b_fc"], _LANE).astype(bf),
    }


def prepare_graph(adj, pool_mat):
    """adj[target, source] in {0,1} (self-loops included) -> additive attention
    bias (0 on edges, -1e9 elsewhere); mean-pool matrix pre-cast to bf16."""
    att_bias = jnp.where(adj > 0.0, 0.0, -1e9).astype(jnp.bfloat16)
    return att_bias, pool_mat.astype(jnp.bfloat16)


def gat_model_forward(x, att_bias, pool_bf16, padded_params,
                      seq_out_len, output_dim):
    g = pool_bf16.shape[0]
    p = padded_params
    out = pl.pallas_call(
        _gat_model_kernel,
        out_shape=jax.ShapeDtypeStruct((g, _LANE), jnp.float32),
        in_specs=[_VMEM] * 11,
        out_specs=_VMEM,
    )(x, att_bias, pool_bf16,
      p["w1"], p["a1"], p["b1"],
      p["w2"], p["a2"], p["b2"],
      p["w_fc"], p["b_fc"])
    out = out[:, : seq_out_len * output_dim]                     # strip lane pad
    return out.reshape(-1, seq_out_len, output_dim)


# --------------------------------- main -------------------------------------

if __name__ == "__main__":
    input_dim = 8
    hidden_dim = 64
    output_dim = 14
    seq_out_len = 4
    nodes_per_graph = 8
    num_graphs = 2
    num_nodes = nodes_per_graph * num_graphs

    key = jax.random.PRNGKey(0)
    keys = jax.random.split(key, 10)

    # node features
    x = jax.random.normal(keys[0], (num_nodes, input_dim), dtype=jnp.float32)

    # edge_index: bidirectional ring inside each graph of 8 nodes
    srcs, dsts = [], []
    for g in range(num_graphs):
        base = g * nodes_per_graph
        for i in range(nodes_per_graph):
            a, b = base + i, base + (i + 1) % nodes_per_graph
            srcs += [a, b]
            dsts += [b, a]
    adj = jnp.zeros((num_nodes, num_nodes), dtype=jnp.float32)
    adj = adj.at[jnp.array(dsts), jnp.array(srcs)].set(1.0)   # adj[target, source]
    adj = adj.at[jnp.arange(num_nodes), jnp.arange(num_nodes)].set(1.0)  # self-loops

    # batch vector -> dense mean-pool matrix [G, N]
    batch = jnp.repeat(jnp.arange(num_graphs), nodes_per_graph)
    pool_mat = (batch[None, :] == jnp.arange(num_graphs)[:, None]).astype(jnp.float32)
    pool_mat = pool_mat / jnp.sum(pool_mat, axis=1, keepdims=True)

    # deterministic parameters (shapes match GATConv(heads=1) + Linear)
    def glorot(k, shape):
        lim = (6.0 / (shape[0] + shape[-1])) ** 0.5
        return jax.random.uniform(k, shape, jnp.float32, -lim, lim)

    params = {
        "w1": glorot(keys[1], (input_dim, hidden_dim)),
        "a1_src": glorot(keys[2], (1, hidden_dim)),
        "a1_dst": glorot(keys[3], (1, hidden_dim)),
        "b1": jnp.zeros((1, hidden_dim), jnp.float32),
        "w2": glorot(keys[4], (hidden_dim, hidden_dim)),
        "a2_src": glorot(keys[5], (1, hidden_dim)),
        "a2_dst": glorot(keys[6], (1, hidden_dim)),
        "b2": jnp.zeros((1, hidden_dim), jnp.float32),
        "w_fc": glorot(keys[7], (hidden_dim, seq_out_len * output_dim)),
        "b_fc": glorot(keys[8], (1, seq_out_len * output_dim)),
    }

    padded = prepare_params(params)
    att_bias, pool_bf16 = prepare_graph(adj, pool_mat)

    out = gat_model_forward(x, att_bias, pool_bf16, padded,
                            seq_out_len, output_dim)
    out = jax.block_until_ready(out)
    assert out.shape == (num_graphs, seq_out_len, output_dim), out.shape
    assert jnp.all(jnp.isfinite(out))
    print("KERNEL_OK")
</pallas_src>

<mosaic_0001>
module attributes {stable_mosaic.version = 11 : i64} {
  func.func @_gat_model_kernel(%arg0: memref<16x8xf32, #tpu.memory_space<vmem>>, %arg1: memref<16x16xbf16, #tpu.memory_space<vmem>>, %arg2: memref<2x16xbf16, #tpu.memory_space<vmem>>, %arg3: memref<8x128xbf16, #tpu.memory_space<vmem>>, %arg4: memref<128x8xbf16, #tpu.memory_space<vmem>>, %arg5: memref<1x128xbf16, #tpu.memory_space<vmem>>, %arg6: memref<128x128xbf16, #tpu.memory_space<vmem>>, %arg7: memref<128x8xbf16, #tpu.memory_space<vmem>>, %arg8: memref<1x128xbf16, #tpu.memory_space<vmem>>, %arg9: memref<128x128xbf16, #tpu.memory_space<vmem>>, %arg10: memref<1x128xbf16, #tpu.memory_space<vmem>>, %arg11: memref<2x128xf32, #tpu.memory_space<vmem>>) attributes {dimension_semantics = [], scalar_prefetch = 0 : i64, scratch_operands = 0 : i64, tpu.core_type = #tpu.core_type<tc>} {
    %c0 = arith.constant 0 : index
    %c0_0 = arith.constant 0 : index
    %0 = vector.load %arg1[%c0, %c0_0] : memref<16x16xbf16, #tpu.memory_space<vmem>>, vector<16x16xbf16>
    %c0_1 = arith.constant 0 : index
    %c0_2 = arith.constant 0 : index
    %1 = vector.load %arg0[%c0_1, %c0_2] : memref<16x8xf32, #tpu.memory_space<vmem>>, vector<16x8xf32>
    %2 = arith.truncf %1 : vector<16x8xf32> to vector<16x8xbf16>
    %c0_3 = arith.constant 0 : index
    %c0_4 = arith.constant 0 : index
    %3 = vector.load %arg3[%c0_3, %c0_4] : memref<8x128xbf16, #tpu.memory_space<vmem>>, vector<8x128xbf16>
    %cst = arith.constant dense<0.000000e+00> : vector<16x128xf32>
    %4 = tpu.matmul %2, %3, %cst {dimension_numbers = #tpu.dot_dimension_numbers<[1], [0], [0], [1], [0, 0, 1, 1], [], []>} : vector<16x8xbf16>, vector<8x128xbf16>, vector<16x128xf32> -> vector<16x128xf32>
    %5 = arith.truncf %4 : vector<16x128xf32> to vector<16x128xbf16>
    %c0_5 = arith.constant 0 : index
    %c0_6 = arith.constant 0 : index
    %6 = vector.load %arg4[%c0_5, %c0_6] : memref<128x8xbf16, #tpu.memory_space<vmem>>, vector<128x8xbf16>
    %cst_7 = arith.constant dense<0.000000e+00> : vector<16x8xf32>
    %7 = tpu.matmul %5, %6, %cst_7 {dimension_numbers = #tpu.dot_dimension_numbers<[1], [0], [0], [1], [0, 0, 1, 1], [], []>} : vector<16x128xbf16>, vector<128x8xbf16>, vector<16x8xf32> -> vector<16x8xf32>
    %8 = vector.extract_strided_slice %7 {offsets = [0, 0], sizes = [16, 1], strides = [1, 1]} : vector<16x8xf32> to vector<16x1xf32>
    %9 = vector.extract_strided_slice %7 {offsets = [0, 1], sizes = [16, 1], strides = [1, 1]} : vector<16x8xf32> to vector<16x1xf32>
    %10 = tpu.transpose %9, [1, 0] : vector<16x1xf32> -> vector<1x16xf32>
    %11 = vector.broadcast %8 : vector<16x1xf32> to vector<16x16xf32>
    %12 = vector.broadcast %10 : vector<1x16xf32> to vector<16x16xf32>
    %13 = arith.addf %11, %12 : vector<16x16xf32>
    %cst_8 = arith.constant 0.000000e+00 : f32
    %14 = vector.broadcast %cst_8 : f32 to vector<16x16xf32>
    %15 = arith.cmpf ogt, %13, %14 : vector<16x16xf32>
    %cst_9 = arith.constant 2.000000e-01 : f32
    %16 = vector.broadcast %cst_9 : f32 to vector<16x16xf32>
    %17 = arith.mulf %16, %13 : vector<16x16xf32>
    %18 = arith.select %15, %13, %17 : vector<16x16xi1>, vector<16x16xf32>
    %19 = arith.extf %0 : vector<16x16xbf16> to vector<16x16xf32>
    %20 = arith.addf %18, %19 : vector<16x16xf32>
    %cst_10 = arith.constant dense<0xFF800000> : vector<16xf32>
    %21 = vector.multi_reduction <maximumf>, %20, %cst_10 [1] : vector<16x16xf32> to vector<16xf32>
    %22 = vector.shape_cast %21 : vector<16xf32> to vector<16x1xf32>
    %23 = vector.broadcast %22 : vector<16x1xf32> to vector<16x16xf32>
    %24 = arith.subf %20, %23 : vector<16x16xf32>
    %25 = math.exp %24 : vector<16x16xf32>
    %cst_11 = arith.constant dense<0.000000e+00> : vector<16xf32>
    %26 = vector.multi_reduction <add>, %25, %cst_11 [1] : vector<16x16xf32> to vector<16xf32>
    %27 = vector.shape_cast %26 : vector<16xf32> to vector<16x1xf32>
    %28 = tpu.reciprocal %27 {approx = true} : vector<16x1xf32> -> vector<16x1xf32>
    %29 = vector.broadcast %28 : vector<16x1xf32> to vector<16x16xf32>
    %30 = arith.mulf %25, %29 : vector<16x16xf32>
    %31 = arith.truncf %30 : vector<16x16xf32> to vector<16x16xbf16>
    %cst_12 = arith.constant dense<0.000000e+00> : vector<16x128xf32>
    %32 = tpu.matmul %31, %5, %cst_12 {dimension_numbers = #tpu.dot_dimension_numbers<[1], [0], [0], [1], [0, 0, 1, 1], [], []>} : vector<16x16xbf16>, vector<16x128xbf16>, vector<16x128xf32> -> vector<16x128xf32>
    %c0_13 = arith.constant 0 : index
    %c0_14 = arith.constant 0 : index
    %33 = vector.load %arg5[%c0_13, %c0_14] : memref<1x128xbf16, #tpu.memory_space<vmem>>, vector<1x128xbf16>
    %34 = arith.extf %33 : vector<1x128xbf16> to vector<1x128xf32>
    %35 = vector.broadcast %34 : vector<1x128xf32> to vector<16x128xf32>
    %36 = arith.addf %32, %35 : vector<16x128xf32>
    %cst_15 = arith.constant 0.000000e+00 : f32
    %37 = vector.broadcast %cst_15 : f32 to vector<16x128xf32>
    %38 = arith.maximumf %36, %37 : vector<16x128xf32>
    %39 = arith.truncf %38 : vector<16x128xf32> to vector<16x128xbf16>
    %c0_16 = arith.constant 0 : index
    %c0_17 = arith.constant 0 : index
    %40 = vector.load %arg6[%c0_16, %c0_17] : memref<128x128xbf16, #tpu.memory_space<vmem>>, vector<128x128xbf16>
    %cst_18 = arith.constant dense<0.000000e+00> : vector<16x128xf32>
    %41 = tpu.matmul %39, %40, %cst_18 {dimension_numbers = #tpu.dot_dimension_numbers<[1], [0], [0], [1], [0, 0, 1, 1], [], []>} : vector<16x128xbf16>, vector<128x128xbf16>, vector<16x128xf32> -> vector<16x128xf32>
    %42 = arith.truncf %41 : vector<16x128xf32> to vector<16x128xbf16>
    %c0_19 = arith.constant 0 : index
    %c0_20 = arith.constant 0 : index
    %43 = vector.load %arg7[%c0_19, %c0_20] : memref<128x8xbf16, #tpu.memory_space<vmem>>, vector<128x8xbf16>
    %cst_21 = arith.constant dense<0.000000e+00> : vector<16x8xf32>
    %44 = tpu.matmul %42, %43, %cst_21 {dimension_numbers = #tpu.dot_dimension_numbers<[1], [0], [0], [1], [0, 0, 1, 1], [], []>} : vector<16x128xbf16>, vector<128x8xbf16>, vector<16x8xf32> -> vector<16x8xf32>
    %45 = vector.extract_strided_slice %44 {offsets = [0, 0], sizes = [16, 1], strides = [1, 1]} : vector<16x8xf32> to vector<16x1xf32>
    %46 = vector.extract_strided_slice %44 {offsets = [0, 1], sizes = [16, 1], strides = [1, 1]} : vector<16x8xf32> to vector<16x1xf32>
    %47 = tpu.transpose %46, [1, 0] : vector<16x1xf32> -> vector<1x16xf32>
    %48 = vector.broadcast %45 : vector<16x1xf32> to vector<16x16xf32>
    %49 = vector.broadcast %47 : vector<1x16xf32> to vector<16x16xf32>
    %50 = arith.addf %48, %49 : vector<16x16xf32>
    %cst_22 = arith.constant 0.000000e+00 : f32
    %51 = vector.broadcast %cst_22 : f32 to vector<16x16xf32>
    %52 = arith.cmpf ogt, %50, %51 : vector<16x16xf32>
    %cst_23 = arith.constant 2.000000e-01 : f32
    %53 = vector.broadcast %cst_23 : f32 to vector<16x16xf32>
    %54 = arith.mulf %53, %50 : vector<16x16xf32>
    %55 = arith.select %52, %50, %54 : vector<16x16xi1>, vector<16x16xf32>
    %56 = arith.extf %0 : vector<16x16xbf16> to vector<16x16xf32>
    %57 = arith.addf %55, %56 : vector<16x16xf32>
    %cst_24 = arith.constant dense<0xFF800000> : vector<16xf32>
    %58 = vector.multi_reduction <maximumf>, %57, %cst_24 [1] : vector<16x16xf32> to vector<16xf32>
    %59 = vector.shape_cast %58 : vector<16xf32> to vector<16x1xf32>
    %60 = vector.broadcast %59 : vector<16x1xf32> to vector<16x16xf32>
    %61 = arith.subf %57, %60 : vector<16x16xf32>
    %62 = math.exp %61 : vector<16x16xf32>
    %cst_25 = arith.constant dense<0.000000e+00> : vector<16xf32>
    %63 = vector.multi_reduction <add>, %62, %cst_25 [1] : vector<16x16xf32> to vector<16xf32>
    %64 = vector.shape_cast %63 : vector<16xf32> to vector<16x1xf32>
    %65 = tpu.reciprocal %64 {approx = true} : vector<16x1xf32> -> vector<16x1xf32>
    %66 = vector.broadcast %65 : vector<16x1xf32> to vector<16x16xf32>
    %67 = arith.mulf %62, %66 : vector<16x16xf32>
    %68 = arith.truncf %67 : vector<16x16xf32> to vector<16x16xbf16>
    %cst_26 = arith.constant dense<0.000000e+00> : vector<16x128xf32>
    %69 = tpu.matmul %68, %42, %cst_26 {dimension_numbers = #tpu.dot_dimension_numbers<[1], [0], [0], [1], [0, 0, 1, 1], [], []>} : vector<16x16xbf16>, vector<16x128xbf16>, vector<16x128xf32> -> vector<16x128xf32>
    %c0_27 = arith.constant 0 : index
    %c0_28 = arith.constant 0 : index
    %70 = vector.load %arg8[%c0_27, %c0_28] : memref<1x128xbf16, #tpu.memory_space<vmem>>, vector<1x128xbf16>
    %71 = arith.extf %70 : vector<1x128xbf16> to vector<1x128xf32>
    %72 = vector.broadcast %71 : vector<1x128xf32> to vector<16x128xf32>
    %73 = arith.addf %69, %72 : vector<16x128xf32>
    %cst_29 = arith.constant 0.000000e+00 : f32
    %74 = vector.broadcast %cst_29 : f32 to vector<16x128xf32>
    %75 = arith.maximumf %73, %74 : vector<16x128xf32>
    %76 = arith.truncf %75 : vector<16x128xf32> to vector<16x128xbf16>
    %c0_30 = arith.constant 0 : index
    %c0_31 = arith.constant 0 : index
    %77 = vector.load %arg2[%c0_30, %c0_31] : memref<2x16xbf16, #tpu.memory_space<vmem>>, vector<2x16xbf16>
    %cst_32 = arith.constant dense<0.000000e+00> : vector<2x128xf32>
    %78 = tpu.matmul %77, %76, %cst_32 {dimension_numbers = #tpu.dot_dimension_numbers<[1], [0], [0], [1], [0, 0, 1, 1], [], []>} : vector<2x16xbf16>, vector<16x128xbf16>, vector<2x128xf32> -> vector<2x128xf32>
    %79 = arith.truncf %78 : vector<2x128xf32> to vector<2x128xbf16>
    %c0_33 = arith.constant 0 : index
    %c0_34 = arith.constant 0 : index
    %80 = vector.load %arg9[%c0_33, %c0_34] : memref<128x128xbf16, #tpu.memory_space<vmem>>, vector<128x128xbf16>
    %cst_35 = arith.constant dense<0.000000e+00> : vector<2x128xf32>
    %81 = tpu.matmul %79, %80, %cst_35 {dimension_numbers = #tpu.dot_dimension_numbers<[1], [0], [0], [1], [0, 0, 1, 1], [], []>} : vector<2x128xbf16>, vector<128x128xbf16>, vector<2x128xf32> -> vector<2x128xf32>
    %c0_36 = arith.constant 0 : index
    %c0_37 = arith.constant 0 : index
    %82 = vector.load %arg10[%c0_36, %c0_37] : memref<1x128xbf16, #tpu.memory_space<vmem>>, vector<1x128xbf16>
    %83 = arith.extf %82 : vector<1x128xbf16> to vector<1x128xf32>
    %84 = vector.broadcast %83 : vector<1x128xf32> to vector<2x128xf32>
    %85 = arith.addf %81, %84 : vector<2x128xf32>
    %c0_38 = arith.constant 0 : index
    %c0_39 = arith.constant 0 : index
    %86 = vector.load %arg11[%c0_38, %c0_39] : memref<2x128xf32, #tpu.memory_space<vmem>>, vector<2x128xf32>
    tpu.vector_store %arg11[%c0_38, %c0_39], %85 {strides = array<i32>} : memref<2x128xf32, #tpu.memory_space<vmem>>, vector<2x128xf32>,
    return
  }
}

</mosaic_0001>

<bundles_post_ra>
// kernel: tpu_custom_call.1
= control target key start
LH: loop header
LB: loop body
LE: loop exit
PB: predicated region body
PF: predicated region fallthrough
CT: control target
= control target key end

     0   :  { %vm50_vm0 = vcmask 1043456   ;;  %v1128_v2 = vmov 0.0   ;;  %vm1129_vm1 = vmmov 0   ;;  %vm46_vm2 = vcmask 64512   ;;  %s1411_s0 = inlined_call_operand.vmem [shape: f32[16,8], index: 0, kind: input, shape index: {}]   ;;  %s1412_s1 = inlined_call_operand.vmem [shape: bf16[16,16], index: 1, kind: input, shape index: {}]   ;;  %s1413_s2 = inlined_call_operand.vmem [shape: bf16[2,16], index: 2, kind: input, shape index: {}]   ;;  %s1414_s3 = inlined_call_operand.vmem [shape: bf16[8,128], index: 3, kind: input, shape index: {}]   ;;  %s1415_s4 = inlined_call_operand.vmem [shape: bf16[128,8], index: 4, kind: input, shape index: {}]   ;;  %s1416_s5 = inlined_call_operand.vmem [shape: bf16[1,128], index: 5, kind: input, shape index: {}]   ;;  %s1417_s6 = inlined_call_operand.vmem [shape: bf16[128,128], index: 6, kind: input, shape index: {}]   ;;  %s1418_s7 = inlined_call_operand.vmem [shape: bf16[128,8], index: 7, kind: input, shape index: {}]   ;;  %s1419_s8 = inlined_call_operand.vmem [shape: bf16[1,128], index: 8, kind: input, shape index: {}]   ;;  %s1420_s9 = inlined_call_operand.vmem [shape: bf16[128,128], index: 9, kind: input, shape index: {}]   ;;  %s1421_s10 = inlined_call_operand.vmem [shape: bf16[1,128], index: 10, kind: input, shape index: {}]   ;;  %s1422_s11 = inlined_call_operand.hbm [shape: f32[2,128], index: 11, kind: output, shape index: {}]  }
   0x1   :  { %v45_v0 = vld [vmem:[%s1414_s3] sm:$0xf]  ;;  %945 = vmatprep.subr.bf16.mxu1 %v1128_v2  ;;  %947 = vmatprep.mubr.msk.bf16.mxu1 %vm1129_vm1, %v1128_v2  ;;  %v43_v4 = vld [vmem:[%s1411_s0 + $0x8] sm:$0xff]  ;;  %v1058_v8 = vld [vmem:[%s1415_s4 + $0x10] sm:$0xff]  }
   0x2   :  { %v42_v1 = vld [vmem:[%s1411_s0] sm:$0xff]  ;;  %v52_v3 = vsel %vm50_vm0, %v45_v0, 0  ;;  %971 = vmatprep.subr.bf16.mxu0 %v1128_v2  ;;  %973 = vmatprep.mubr.msk.bf16.mxu0 %vm1129_vm1, %v1128_v2  ;;  %v1057_v7 = vld [vmem:[%s1415_s4 + $0x8] sm:$0xff]   ;;  %v1059_v9 = vld [vmem:[%s1415_s4 + $0x18] sm:$0xff]  }
   0x3   :  { %v1056_v5 = vld [vmem:[%s1415_s4] sm:$0xff]   ;;  %946 = vmatpush3.bf16.msra.mxu1 %v52_v3  ;;  %v44_v6 = vpack.c.bf16 %v43_v4, %v42_v1  ;;  %v1061_v11 = vld [vmem:[%s1415_s4 + $0x28] sm:$0xff]  }
   0x4   :  { %951 = vmatprep.subr.bf16.mxu1 %v1128_v2  ;;  %v1060_v10 = vld [vmem:[%s1415_s4 + $0x20] sm:$0xff]  }
   0x6   :  { %948 = vmatmul.mubr.msk.bf16.vlgmr.msra.gmra.mrb[0].mxu1 %vm46_vm2, %v44_v6 }
   0x7   :  { %952 = vmatpush3.bf16.msra.mxu1 %v1056_v5  ;;  %967 = vmatprep.mubr.msk.bf16.mxu1 %vm1129_vm1, %v1128_v2 }
   0x8   :  { %953 = vmatprep.subr.bf16.mxu1 %v1128_v2 }
   0xb   :  { %954 = vmatpush3.bf16.msra.mxu1 %v1057_v7 }
   0xc   :  { %955 = vmatprep.subr.bf16.mxu1 %v1128_v2 }
   0xf   :  { %956 = vmatpush3.bf16.msra.mxu1 %v1058_v8 }
  0x10   :  { %957 = vmatprep.subr.bf16.mxu1 %v1128_v2 }
  0x13   :  { %958 = vmatpush3.bf16.msra.mxu1 %v1059_v9 }
  0x14   :  { %959 = vmatprep.subr.bf16.mxu1 %v1128_v2 }
  0x17   :  { %960 = vmatpush3.bf16.msra.mxu1 %v1060_v10 }
  0x18   :  { %961 = vmatprep.subr.bf16.mxu1 %v1128_v2 }
  0x19   :  { %16 = vsyncpa [#allocation3], 0  ;;  %v1062_v12 = vld [vmem:[%s1415_s4 + $0x30] sm:$0xff]   ;;  %v1063_v13 = vld [vmem:[%s1415_s4 + $0x38] sm:$0xff]   ;;  %v1130_v14 = vmov 0   ;;  %s1131_s4 = smov 127   ;;  %v249_v26 = vlaneseq }
  0x1a   :  { %1054 = vset.pattern.permute.xlu1 %v1130_v14  ;;  %v1254_v32 = vld [vmem:[%s1412_s1] sm:$0xff]   ;;  %vm265_vm5 = vcmask 130048   ;;  %v1065_v0 = vld [vmem:[%s1417_s6 + $0x8] sm:$0xff]   ;;  %v1066_v1 = vld [vmem:[%s1417_s6 + $0x10] sm:$0xff]   ;;  %s1132_s3 = smov [#allocation2]  }
  0x1b   :  { %962 = vmatpush3.bf16.msra.mxu1 %v1061_v11  ;;  %v250_v27 = vshrl.u32 %v249_v26, 7  ;;  %v900_v36 = vunpack.c.h.bf16 %v1254_v32  ;;  %v899_v37 = vunpack.c.l.bf16 %v1254_v32  ;;  %v1064_v62 = vld [vmem:[%s1417_s6] sm:$0xff]   ;;  %v1067_v3 = vld [vmem:[%s1417_s6 + $0x18] sm:$0xff]   ;;  %v1069_v5 = vld [vmem:[%s1417_s6 + $0x28] sm:$0xff]   ;;  %s853_s24 = sshll.u32 %s1132_s3, 4  ;;  %s854_s24 = int_to_ptr.vmem [resolvable:$true] %s853_s24 }
  0x1c   :  { %963 = vmatprep.subr.bf16.mxu1 %v1128_v2  ;;  %v1068_v4 = vld [vmem:[%s1417_s6 + $0x20] sm:$0xff]   ;;  %v1070_v6 = vld [vmem:[%s1417_s6 + $0x30] sm:$0xff]   ;;  %v1071_v7 = vld [vmem:[%s1417_s6 + $0x38] sm:$0xff]   ;;  %p1109_p1 = scmp.lt.s32.totalorder %s854_s24, %s854_s24 }
  0x1d   :  { %v1248_v29 = vsub.s32 0, %v250_v27  ;;  %v1072_v8 = vld [vmem:[%s1418_s7] sm:$0xff]   ;;  %v1073_v9 = vld [vmem:[%s1418_s7 + $0x8] sm:$0xff]   ;;  %v1074_v10 = vld [vmem:[%s1418_s7 + $0x10] sm:$0xff]  }
  0x1e   :  { %v1075_v11 = vld [vmem:[%s1418_s7 + $0x18] sm:$0xff]  }
  0x1f   :  { %964 = vmatpush3.bf16.msra.mxu1 %v1062_v12  ;;  %v1076_v12 = vld [vmem:[%s1418_s7 + $0x20] sm:$0xff]   ;;  %v1079_v27 = vld [vmem:[%s1418_s7 + $0x38] sm:$0xff]  }
  0x20   :  { %965 = vmatprep.subr.bf16.mxu1 %v1128_v2 }
  0x23   :  { %966 = vmatpush3.bf16.msra.mxu1 %v1063_v13  ;;  %v1077_v13 = vld [vmem:[%s1418_s7 + $0x28] sm:$0xff]  }
  0x24   :  { %997 = vmatprep.subr.bf16.mxu1 %v1128_v2 }
  0xd9   :  { %v88_v15 = vpop.f32.mrb[0].mxu1 }
  0xda   :  { %v949_v16 = vpop.f32.mrb[1].mxu1 }
  0xdb   :  { %v91_v17 = vpop.f32.mrb[2].mxu1 }
  0xdc   :  { %v95_v18 = vpack.c.bf16 %v91_v17, %v88_v15  ;;  %v950_v19 = vpop.f32.mrb[3].mxu1  ;;  %v289_v15 = vld [vmem:[%s1416_s5] sm:$0x1] }
  0xdd   :  { %v290_v16 = vunpack.c.l.bf16 %v289_v15 }
  0xde   :  { %968 = vmatmul.mubr.bf16.vlgmr.msra.gmra.mrb[4].mxu1 %v95_v18  ;;  %972 = vmatpush3.bf16.msra.mxu0 %v95_v18 }
  0xdf   :  { %977 = vmatprep.subr.bf16.mxu0 %v1128_v2  ;;  %1013 = vmatprep.mubr.msk.bf16.mxu1 %vm1129_vm1, %v1128_v2  ;;  %v294_v17 = vrot.slane %v290_v16, %v1248_v29 }
  0xe0   :  { %998 = vmatpush3.bf16.msra.mxu1 %v1072_v8  ;;  %v638_v8 = vld [vmem:[%s1419_s8] sm:$0x1] }
  0xe1   :  { %999 = vmatprep.subr.bf16.mxu1 %v1128_v2 }
  0xe4   :  { %1000 = vmatpush3.bf16.msra.mxu1 %v1073_v9  ;;  %v639_v9 = vunpack.c.l.bf16 %v638_v8 }
  0xe5   :  { %1001 = vmatprep.subr.bf16.mxu1 %v1128_v2 }
  0xe8   :  { %1002 = vmatpush3.bf16.msra.mxu1 %v1074_v10  ;;  %v643_v10 = vrot.slane %v639_v9, %v1248_v29 }
  0xe9   :  { %1003 = vmatprep.subr.bf16.mxu1 %v1128_v2 }
  0xec   :  { %1004 = vmatpush3.bf16.msra.mxu1 %v1075_v11 }
  0xed   :  { %1005 = vmatprep.subr.bf16.mxu1 %v1128_v2 }
  0xf0   :  { %1006 = vmatpush3.bf16.msra.mxu1 %v1076_v12 }
  0xf1   :  { %1007 = vmatprep.subr.bf16.mxu1 %v1128_v2 }
  0xf4   :  { %1008 = vmatpush3.bf16.msra.mxu1 %v1077_v13 }
  0xf5   :  { %1009 = vmatprep.subr.bf16.mxu1 %v1128_v2 }
 0x1b1   :  { %v194_v20 = vpop.f32.mrb[4].mxu1 }
 0x1b2   :  { %242 = vperm.xlu1 %1054, %v194_v20   ;;  %203 = vrot.lane.b32.xlu0 %v194_v20, %s1131_s4  ;;  %v969_v21 = vpop.f32.mrb[5].mxu1 }
 0x1b3   :  { %v197_v22 = vpop.f32.mrb[6].mxu1 }
 0x1b4   :  { %v970_v23 = vpop.f32.mrb[7].mxu1 }
 0x1b6   :  { %246 = vperm.xlu1 %1054, %v197_v22   ;;  %205 = vrot.lane.b32.xlu0 %v197_v22, %s1131_s4 }
 0x224   :  { %v204_v24 = vpop.permute.xlu0 %203 }
 0x225   :  { %209 = vxpose.xlu0.b32.start [1/2] (short) (narrow) %v204_v24, 8 }
 0x228   :  { %v206_v25 = vpop.permute.xlu0 %205 }
 0x229   :  { %210 = vxpose.xlu0.b32.end [2/2] (short) (narrow) %v206_v25, 8 }
 0x231   :  { %v243_v28 = vpop.permute.xlu1 %242 }
 0x235   :  { %v247_v33 = vpop.permute.xlu1 %246 }
 0x252   :  { %1055 = vset.pattern.permute.xlu0 %v1130_v14  ;;  %v1078_v14 = vld [vmem:[%s1418_s7 + $0x30] sm:$0xff]  }
 0x253   :  { %1010 = vmatpush3.bf16.msra.mxu1 %v1078_v14 }
 0x254   :  { %1011 = vmatprep.subr.bf16.mxu1 %v1128_v2 }
 0x257   :  { %1012 = vmatpush3.bf16.msra.mxu1 %v1079_v27  ;;  %v1086_v27 = vld [vmem:[%s1420_s9 + $0x30] sm:$0xff]  }
 0x258   :  { %1017 = vmatprep.subr.bf16.mxu1 %v1128_v2 }
 0x2a5   :  { %v225_v30 = vpop.trf.xlu0 }
 0x2a6   :  { %v252_v31 = vrot.slane %v225_v30, %v1248_v29 }
 0x2a8   :  { %v253_v34 = vadd.f32 %v252_v31, %v243_v28  ;;  %v254_v35 = vadd.f32 %v252_v31, %v247_v33 }
 0x2aa   :  { %v257_v38 = vmul.f32 0.2, %v253_v34  ;;  %v258_v39 = vmul.f32 0.2, %v254_v35  ;;  %vm256_vm3 = vcmp.gt.f32.partialorder %v254_v35, 0.0  ;;  %vm255_vm4 = vcmp.gt.f32.partialorder %v253_v34, 0.0 }
 0x2ac   :  { %v260_v40 = vsel %vm256_vm3, %v254_v35, %v258_v39  ;;  %v259_v41 = vsel %vm255_vm4, %v253_v34, %v257_v38 }
 0x2ad   :  { %v264_v42 = vadd.f32 %v900_v36, %v260_v40  ;;  %v263_v43 = vadd.f32 %v899_v37, %v259_v41 }
 0x2af   :  { %v269_v44 = vsel %vm265_vm5, %v264_v42, -inf  ;;  %v266_v45 = vsel %vm265_vm5, %v263_v43, -inf }
 0x2b0   :  { %270 = vmax.xlane.f32.xlu0 %v269_v44  ;;  %267 = vmax.xlane.f32.xlu1 %v266_v45 }
 0x33d   :  { %v271_v46 = vpop.xlane.xlu0 %270  ;;  %v268_v47 = vpop.xlane.xlu1 %267 }
 0x33e   :  { %v273_v48 = vsub.f32 %v264_v42, %v271_v46  ;;  %v272_v49 = vsub.f32 %v263_v43, %v268_v47 }
 0x340   :  { %v274_v50 = vmul.f32 1.442695, %v272_v49  ;;  %v276_v51 = vmul.f32 1.442695, %v273_v48 }
 0x342   :  { %1088 = vpow2.f32 %v274_v50 }
 0x343   :  { %1090 = vpow2.f32 %v276_v51 }
 0x34c   :  { %v1089_v52 = vpop.eup %1088 }
 0x34d   :  { %v278_v53 = vsel %vm265_vm5, %v1089_v52, 0.0  ;;  %v1091_v54 = vpop.eup %1090 }
 0x34e   :  { %279 = vadd.xlane.f32.xlu1 %v278_v53  ;;  %v281_v55 = vsel %vm265_vm5, %v1091_v54, 0.0 }
 0x352   :  { %282 = vadd.xlane.f32.xlu1 %v281_v55 }
 0x3db   :  { %v280_v56 = vpop.xlane.xlu1 %279 }
 0x3dc   :  { %1092 = vrcp.f32 %v280_v56 }
 0x3df   :  { %v283_v57 = vpop.xlane.xlu1 %282 }
 0x3e0   :  { %1094 = vrcp.f32 %v283_v57 }
 0x3e6   :  { %v1093_v58 = vpop.eup %1092 }
 0x3e7   :  { %v286_v60 = vmul.f32 %v1093_v58, %v1089_v52 }
 0x3ea   :  { %v1095_v59 = vpop.eup %1094 }
 0x3eb   :  { %v287_v61 = vmul.f32 %v1095_v59, %v1091_v54 }
 0x3ed   :  { %v288_v63 = vpack.c.bf16 %v287_v61, %v286_v60 }
 0x3ef   :  { %974 = vmatmul.mubr.msk.bf16.vlgmr.msra.gmra.mrb[0].mxu0 %vm265_vm5, %v288_v63 }
 0x3f0   :  { %978 = vmatpush3.bf16.msra.mxu0 %v1064_v62  ;;  %993 = vmatprep.mubr.msk.bf16.mxu0 %vm1129_vm1, %v1128_v2 }
 0x3f1   :  { %979 = vmatprep.subr.bf16.mxu0 %v1128_v2 }
 0x3f4   :  { %980 = vmatpush3.bf16.msra.mxu0 %v1065_v0 }
 0x3f5   :  { %981 = vmatprep.subr.bf16.mxu0 %v1128_v2 }
 0x3f8   :  { %982 = vmatpush3.bf16.msra.mxu0 %v1066_v1 }
 0x3f9   :  { %983 = vmatprep.subr.bf16.mxu0 %v1128_v2 }
 0x3fc   :  { %984 = vmatpush3.bf16.msra.mxu0 %v1067_v3 }
 0x3fd   :  { %985 = vmatprep.subr.bf16.mxu0 %v1128_v2 }
 0x400   :  { %986 = vmatpush3.bf16.msra.mxu0 %v1068_v4 }
 0x401   :  { %987 = vmatprep.subr.bf16.mxu0 %v1128_v2 }
 0x404   :  { %988 = vmatpush3.bf16.msra.mxu0 %v1069_v5 }
 0x405   :  { %989 = vmatprep.subr.bf16.mxu0 %v1128_v2 }
 0x408   :  { %990 = vmatpush3.bf16.msra.mxu0 %v1070_v6 }
 0x409   :  { %991 = vmatprep.subr.bf16.mxu0 %v1128_v2 }
 0x40c   :  { %992 = vmatpush3.bf16.msra.mxu0 %v1071_v7 }
 0x40d   :  { %1023 = vmatprep.subr.bf16.mxu0 %v1128_v2 }
 0x4c2   :  { %v332_v18 = vpop.f32.mrb[0].mxu0 }
 0x4c3   :  { %v333_v19 = vadd.f32 %v332_v18, %v294_v17  ;;  %v975_v20 = vpop.f32.mrb[1].mxu0 }
 0x4c4   :  { %v335_v21 = vpop.f32.mrb[2].mxu0  ;;  %v691_v20 = vld [vmem:[%s1413_s2] sm:$0x1] }
 0x4c5   :  { %v336_v22 = vadd.f32 %v335_v21, %v294_v17  ;;  %v976_v23 = vpop.f32.mrb[3].mxu0  ;;  %v339_v24 = vmax.f32 %v333_v19, 0.0  ;;  %v1080_v21 = vld [vmem:[%s1420_s9] sm:$0xff]  }
 0x4c6   :  { %v1082_v23 = vld [vmem:[%s1420_s9 + $0x10] sm:$0xff]  }
 0x4c7   :  { %v340_v25 = vmax.f32 %v336_v22, 0.0  ;;  %v1081_v22 = vld [vmem:[%s1420_s9 + $0x8] sm:$0xff]  }
 0x4c9   :  { %v341_v26 = vpack.c.bf16 %v340_v25, %v339_v24  ;;  %v1083_v24 = vld [vmem:[%s1420_s9 + $0x18] sm:$0xff]   ;;  %v1084_v25 = vld [vmem:[%s1420_s9 + $0x20] sm:$0xff]  }
 0x4cb   :  { %994 = vmatmul.mubr.bf16.vlgmr.msra.gmra.mrb[4].mxu0 %v341_v26  ;;  %v1085_v26 = vld [vmem:[%s1420_s9 + $0x28] sm:$0xff]  }
 0x4cc   :  { %1025 = vmatprep.mubr.msk.bf16.mxu0 %vm1129_vm1, %v1128_v2 }
 0x59e   :  { %v440_v28 = vpop.f32.mrb[4].mxu0 }
 0x59f   :  { %v995_v30 = vpop.f32.mrb[5].mxu0 }
 0x5a0   :  { %v443_v31 = vpop.f32.mrb[6].mxu0 }
 0x5a1   :  { %v447_v33 = vpack.c.bf16 %v443_v31, %v440_v28  ;;  %v996_v34 = vpop.f32.mrb[7].mxu0  ;;  %v1087_v28 = vld [vmem:[%s1420_s9 + $0x38] sm:$0xff]   ;;  %s1104_s9 = scalar_lea.vmem %s854_s24, 32 }
 0x5a2   :  { %p1105_p0 = scmp.ne.s32.totalorder %s854_s24, %s1104_s9  ;;  %p1110_p2 = scmp.lt.s32.totalorder %s1104_s9, %s1104_s9 }
 0x5a3   :  { %1014 = vmatmul.mubr.bf16.vlgmr.msra.gmra.mrb[8].mxu1 %v447_v33 }
 0x5a4   :  { %1018 = vmatpush3.bf16.msra.mxu1 %v447_v33  ;;  %1019 = vmatprep.mubr.msk.bf16.mxu1 %vm1129_vm1, %v1128_v2  ;;  %p1111_p3 = por %p1110_p2, %p1109_p1 }
 0x5a6   :  { %p1112_p4 = pnand %p1111_p3, %p1105_p0 }
 0x676   :  { %v546_v35 = vpop.f32.mrb[8].mxu1 }
 0x677   :  { %555 = vrot.lane.b32.xlu1 %v546_v35, %s1131_s4  ;;  %v1015_v38 = vpop.f32.mrb[9].mxu1 }
 0x678   :  { %v549_v39 = vpop.f32.mrb[10].mxu1  ;;  %v752_v38 = vld [vmem:[%s1421_s10] sm:$0x1] }
 0x679   :  { %v1016_v40 = vpop.f32.mrb[11].mxu1 }
 0x67b   :  { %557 = vrot.lane.b32.xlu1 %v549_v39, %s1131_s4 }
 0x67f   :  { %594 = vperm.xlu1 %1054, %v546_v35  }
 0x683   :  { %598 = vperm.xlu1 %1054, %v549_v39   ;;  %v753_v39 = vunpack.c.l.bf16 %v752_v38 }
 0x685   :  { %v757_v40 = vrot.slane %v753_v39, %v1248_v29 }
 0x6e9   :  { %v556_v41 = vpop.permute.xlu1 %555 }
 0x6ea   :  { %561 = vxpose.xlu1.b32.start [1/2] (short) (narrow) %v556_v41, 8 }
 0x6ed   :  { %v558_v42 = vpop.permute.xlu1 %557 }
 0x6ee   :  { %562 = vxpose.xlu1.b32.end [2/2] (short) (narrow) %v558_v42, 8 }
 0x6fe   :  { %v595_v43 = vpop.permute.xlu1 %594 }
 0x702   :  { %v599_v44 = vpop.permute.xlu1 %598 }
 0x76a   :  { %v577_v45 = vpop.trf.xlu1 }
 0x76b   :  { %v604_v46 = vrot.slane %v577_v45, %v1248_v29 }
 0x76d   :  { %v605_v47 = vadd.f32 %v604_v46, %v595_v43  ;;  %v606_v48 = vadd.f32 %v604_v46, %v599_v44 }
 0x76f   :  { %v609_v49 = vmul.f32 0.2, %v605_v47  ;;  %v610_v50 = vmul.f32 0.2, %v606_v48  ;;  %vm607_vm6 = vcmp.gt.f32.partialorder %v605_v47, 0.0  ;;  %vm608_vm7 = vcmp.gt.f32.partialorder %v606_v48, 0.0 }
 0x771   :  { %v611_v51 = vsel %vm607_vm6, %v605_v47, %v609_v49  ;;  %v612_v52 = vsel %vm608_vm7, %v606_v48, %v610_v50 }
 0x772   :  { %v613_v53 = vadd.f32 %v899_v37, %v611_v51  ;;  %v614_v55 = vadd.f32 %v900_v36, %v612_v52 }
 0x774   :  { %v615_v54 = vsel %vm265_vm5, %v613_v53, -inf  ;;  %v618_v56 = vsel %vm265_vm5, %v614_v55, -inf }
 0x775   :  { %616 = vmax.xlane.f32.xlu0 %v615_v54 }
 0x779   :  { %619 = vmax.xlane.f32.xlu0 %v618_v56 }
 0x802   :  { %v617_v57 = vpop.xlane.xlu0 %616 }
 0x803   :  { %v621_v58 = vsub.f32 %v613_v53, %v617_v57 }
 0x805   :  { %v623_v59 = vmul.f32 1.442695, %v621_v58 }
 0x806   :  { %v620_v60 = vpop.xlane.xlu0 %619 }
 0x807   :  { %1096 = vpow2.f32 %v623_v59  ;;  %v622_v61 = vsub.f32 %v614_v55, %v620_v60 }
 0x809   :  { %v625_v62 = vmul.f32 1.442695, %v622_v61 }
 0x80b   :  { %1098 = vpow2.f32 %v625_v62 }
 0x811   :  { %v1097_v63 = vpop.eup %1096 }
 0x812   :  { %v627_v37 = vsel %vm265_vm5, %v1097_v63, 0.0 }
 0x813   :  { %628 = vadd.xlane.f32.xlu0 %v627_v37 }
 0x815   :  { %v1099_v0 = vpop.eup %1098 }
 0x816   :  { %v630_v32 = vsel %vm265_vm5, %v1099_v0, 0.0 }
 0x817   :  { %631 = vadd.xlane.f32.xlu0 %v630_v32 }
 0x8a0   :  { %v629_v36 = vpop.xlane.xlu0 %628 }
 0x8a1   :  { %1100 = vrcp.f32 %v629_v36 }
 0x8a4   :  { %v632_v1 = vpop.xlane.xlu0 %631 }
 0x8a5   :  { %1102 = vrcp.f32 %v632_v1 }
 0x8ab   :  { %v1101_v3 = vpop.eup %1100 }
 0x8ac   :  { %v635_v5 = vmul.f32 %v1101_v3, %v1097_v63 }
 0x8af   :  { %v1103_v4 = vpop.eup %1102 }
 0x8b0   :  { %v636_v6 = vmul.f32 %v1103_v4, %v1099_v0 }
 0x8b2   :  { %v637_v7 = vpack.c.bf16 %v636_v6, %v635_v5 }
 0x8b4   :  { %1020 = vmatmul.mubr.msk.bf16.vlgmr.msra.gmra.mrb[12].mxu1 %vm265_vm5, %v637_v7 }
 0x987   :  { %v681_v11 = vpop.f32.mrb[12].mxu1 }
 0x988   :  { %v682_v12 = vadd.f32 %v681_v11, %v643_v10  ;;  %v1021_v13 = vpop.f32.mrb[13].mxu1 }
 0x989   :  { %v684_v14 = vpop.f32.mrb[14].mxu1 }
 0x98a   :  { %v685_v15 = vadd.f32 %v684_v14, %v643_v10  ;;  %v1022_v16 = vpop.f32.mrb[15].mxu1  ;;  %v688_v17 = vmax.f32 %v682_v12, 0.0 }
 0x98c   :  { %v689_v18 = vmax.f32 %v685_v15, 0.0 }
 0x98e   :  { %v690_v19 = vpack.c.bf16 %v689_v18, %v688_v17 }
 0x990   :  { %1024 = vmatpush3.bf16.msra.mxu0 %v690_v19 }
 0x991   :  { %1029 = vmatprep.subr.bf16.mxu0 %v1128_v2 }
 0x993   :  { %1026 = vmatmul.mubr.msk.bf16.vlgmr.msra.gmra.mrb[8].mxu0 %vm265_vm5, %v691_v20 }
 0x994   :  { %1030 = vmatpush3.bf16.msra.mxu0 %v1080_v21  ;;  %1045 = vmatprep.mubr.msk.bf16.mxu0 %vm1129_vm1, %v1128_v2 }
 0x995   :  { %1031 = vmatprep.subr.bf16.mxu0 %v1128_v2 }
 0x998   :  { %1032 = vmatpush3.bf16.msra.mxu0 %v1081_v22 }
 0x999   :  { %1033 = vmatprep.subr.bf16.mxu0 %v1128_v2 }
 0x99c   :  { %1034 = vmatpush3.bf16.msra.mxu0 %v1082_v23 }
 0x99d   :  { %1035 = vmatprep.subr.bf16.mxu0 %v1128_v2 }
 0x9a0   :  { %1036 = vmatpush3.bf16.msra.mxu0 %v1083_v24 }
 0x9a1   :  { %1037 = vmatprep.subr.bf16.mxu0 %v1128_v2 }
 0x9a4   :  { %1038 = vmatpush3.bf16.msra.mxu0 %v1084_v25 }
 0x9a5   :  { %1039 = vmatprep.subr.bf16.mxu0 %v1128_v2 }
 0x9a8   :  { %1040 = vmatpush3.bf16.msra.mxu0 %v1085_v26 }
 0x9a9   :  { %1041 = vmatprep.subr.bf16.mxu0 %v1128_v2 }
 0x9ac   :  { %1042 = vmatpush3.bf16.msra.mxu0 %v1086_v27 }
 0x9ad   :  { %1043 = vmatprep.subr.bf16.mxu0 %v1128_v2 }
 0x9b0   :  { %1044 = vmatpush3.bf16.msra.mxu0 %v1087_v28 }
 0xa66   :  { %v729_v30 = vpop.f32.mrb[8].mxu0 }
 0xa67   :  { %v735_v31 = vpack.c.bf16 %v729_v30, %v729_v30  ;;  %v1027_v33 = vpop.f32.mrb[9].mxu0 }
 0xa68   :  { %v732_v34 = vpop.f32.mrb[10].mxu0 }
 0xa69   :  { %v1028_v35 = vpop.f32.mrb[11].mxu0  ;;  %1046 = vmatmul.mubr.bf16.vlgmr.msra.gmra.mrb[12].mxu0 %v735_v31 }
 0xb3c   :  { %v840_v2 = vpop.f32.mrb[12].mxu0 }
 0xb3d   :  { %v841_v41 = vadd.f32 %v840_v2, %v757_v40  ;;  %v1047_v42 = vpop.f32.mrb[13].mxu0 }
 0xb3e   :  { %v843_v43 = vpop.f32.mrb[14].mxu0 }
 0xb3f   :  { %846 = vst [vmem:[#allocation2] sm:$0x3] %v841_v41  ;;  %v1048_v44 = vpop.f32.mrb[15].mxu0 }
 0xb40   :  { %1115 = shalt.err (!%p1112_p4)
}
 0xb41   :  { %s1116_s0 = scalar_lea.hbm %s1422_s11, 32 }
 0xb42   :  { %p1117_p5 = scmp.ne.s32.totalorder %s1422_s11, %s1116_s0  ;;  %p1120_p6 = scmp.lt.u32.totalorder %s1116_s0, %s1422_s11 }
 0xb44   :  { %p1122_p7 = pnand %p1120_p6, %p1117_p5 }
 0xb46   :  { %1125 = shalt.err (!%p1122_p7)
}
 0xb47   :  { %856 = dma.vmem_to_hbm [thread:$0]  %s854_s24, 32, %s1422_s11, [#allocation3]  }
 0xb48   :  { %1126 = dma.done.wait [#allocation3], 32  }
 0xb49   :  { %1127 = vsyncadd [#allocation3], 4294967264 }
 0xb4a   :  { %860 = vsyncpa [#allocation3], 1 }

</bundles_post_ra>
